<compile_context>
chip_gen: v7x
topology: tpu7x:2x2x1
jax: 0.10.0
libtpu: 0.0.40
codegen_flags: <defaults>
</compile_context>

<pallas_src>
import math

import jax
import jax.numpy as jnp
import numpy as np
from jax import lax
from jax.experimental import pallas as pl
from jax.experimental.pallas import tpu as pltpu


def _round_up(x: int, m: int) -> int:
    return (x + m - 1) // m * m


def _split_f32_to_3bf16(x):
    """Exact 3-way bf16 decomposition: hi + mid + lo == x (bitwise, for f32 input)."""
    f32, bf16 = jnp.float32, jnp.bfloat16
    hi = x.astype(bf16)
    r1 = x - hi.astype(f32)
    mid = r1.astype(bf16)
    lo = (r1 - mid.astype(f32)).astype(bf16)
    return hi, mid, lo


def _make_tokenizer_kernel(n_cat: int):
    def kernel(xnum_ref, xcat_ref, rep_ref, wflat_ref, bnum_ref,
               mhi_ref, mmid_ref, mlo_ref, bcat_ref, onum_ref, ocat_ref):
        # xnum_ref : (TB, d_num)        f32   numerical features
        # xcat_ref : (TB, n_cat)        i32   categorical indices (already offset)
        # rep_ref  : (d_num, LN_pad)    bf16  0/1 lane-replication matrix
        # wflat_ref: (1, LN_pad)        f32   flattened numeric token weights
        # bnum_ref : (1, LN_pad)        f32   flattened numeric bias ([CLS] folded in)
        # m*_ref   : (n_emb, LC_pad)    bf16  block-placed embedding table (hi/mid/lo)
        # bcat_ref : (1, LC_pad)        f32   flattened categorical bias
        # onum_ref : (TB, LN_pad)             numeric token slab (lane-dense)
        # ocat_ref : (TB, LC_pad)             categorical token slab (lane-dense)
        f32, bf16 = jnp.float32, jnp.bfloat16
        tb = xnum_ref.shape[0]
        n_emb = mhi_ref.shape[0]

        # ---- numeric tokens: token j+1 = weight[j+1] * x_num[:, j] ----
        # Lane-replicate x_num columns via a 0/1 bf16 matmul; x_num is split into 3 exact
        # bf16 components so three single-pass matmuls reproduce it exactly (vs 6-pass
        # HIGHEST f32).  The weight multiply is a plain f32 VPU op == reference math.
        x = xnum_ref[...]
        x_hi, x_mid, x_lo = _split_f32_to_3bf16(x)
        rep = rep_ref[...]
        xrep = jnp.dot(x_hi, rep, preferred_element_type=f32)
        xrep += jnp.dot(x_mid, rep, preferred_element_type=f32)
        xrep += jnp.dot(x_lo, rep, preferred_element_type=f32)
        onum_ref[...] = (xrep * wflat_ref[...] + bnum_ref[...]).astype(onum_ref.dtype)

        # ---- categorical tokens: embedding gather as a multi-hot MXU matmul ----
        # Multi-hot built directly in bf16 (0/1 exact).  Embedding table pre-split into
        # 3 exact bf16 components -> 3 single-pass matmuls, bit-exact gather.
        idx = xcat_ref[...]
        iota = lax.broadcasted_iota(jnp.int32, (tb, n_emb), 1)
        mh = jnp.zeros((tb, n_emb), bf16)
        for c in range(n_cat):                     # small static unroll (VPU)
            mh += (iota == idx[:, c:c + 1]).astype(bf16)
        acc = jnp.dot(mh, mhi_ref[...], preferred_element_type=f32)
        acc += jnp.dot(mh, mmid_ref[...], preferred_element_type=f32)
        acc += jnp.dot(mh, mlo_ref[...], preferred_element_type=f32)
        ocat_ref[...] = (acc + bcat_ref[...]).astype(ocat_ref.dtype)

    return kernel


def _prepare_params(weight, emb_table, bias, category_offsets, lane_align=128):
    """Build trimmed, lane-padded matmul operands (one-time parameter prep)."""
    n_num1, d_token = weight.shape
    d_num = n_num1 - 1
    n_emb = emb_table.shape[0]
    offs = np.asarray(category_offsets, np.int64)
    n_cat = offs.shape[0]
    sizes = np.diff(np.append(offs, n_emb))              # per-category vocab sizes
    LN = n_num1 * d_token
    LC = n_cat * d_token
    LN_pad = _round_up(LN, lane_align)
    LC_pad = _round_up(LC, lane_align)

    w_np = np.asarray(weight, np.float32)
    emb_np = np.asarray(emb_table, np.float32)

    # 0/1 replication matrix: row j carries ones in token (j+1)'s d_token-wide block.
    rep3 = np.zeros((d_num, n_num1, d_token), np.float32)
    rep3[np.arange(d_num), np.arange(1, n_num1), :] = 1.0
    rep = np.zeros((d_num, LN_pad), np.float32)
    rep[:, :LN] = rep3.reshape(d_num, LN)

    # Flattened numeric token weights (block 0 / [CLS] left zero: it is folded into bias).
    w_flat = np.zeros((1, LN_pad), np.float32)
    w_flat[0, d_token:LN] = w_np[1:].reshape(-1)

    # Flattened biases; [CLS] value weight[0] * 1 folded into numeric bias block 0.
    b_num = np.zeros((1, LN_pad), np.float32)
    b_num[0, :d_token] = w_np[0]
    b_cat = np.zeros((1, LC_pad), np.float32)
    if bias is not None:
        b_np = np.asarray(bias, np.float32)
        b_num[0, d_token:LN] = b_np[:d_num].reshape(-1)
        b_cat[0, :LC] = b_np[d_num:].reshape(-1)

    # Block-placed embedding table (zero-trimmed): row e carries emb[e] only in its
    # own category's d_token-wide block.
    cat_of_row = np.repeat(np.arange(n_cat), sizes)
    m3 = np.zeros((n_emb, n_cat, d_token), np.float32)
    m3[np.arange(n_emb), cat_of_row, :] = emb_np
    m_cat = np.zeros((n_emb, LC_pad), np.float32)
    m_cat[:, :LC] = m3.reshape(n_emb, LC)
    m_hi, m_mid, m_lo = _split_f32_to_3bf16(jnp.asarray(m_cat))

    params = dict(
        rep=jnp.asarray(rep, jnp.bfloat16),
        w_flat=jnp.asarray(w_flat),
        b_num=jnp.asarray(b_num),
        m_hi=m_hi, m_mid=m_mid, m_lo=m_lo,
        b_cat=jnp.asarray(b_cat),
    )
    dims = dict(n_num1=n_num1, d_num=d_num, d_token=d_token, n_emb=n_emb, n_cat=n_cat,
                LN=LN, LC=LC, LN_pad=LN_pad, LC_pad=LC_pad)
    return params, dims


def tokenizer_forward(x_num, x_cat, weight, emb_table, bias, category_offsets,
                      *, block_b=None, lane_align=128,
                      vmem_budget_bytes=40 * 1024 * 1024):
    """Pallas implementation of Tokenizer.forward (categories present, bias optional)."""
    B, d_num_in = x_num.shape
    params, dims = _prepare_params(weight, emb_table, bias, category_offsets, lane_align)
    d_num, n_cat, n_emb = dims["d_num"], dims["n_cat"], dims["n_emb"]
    LN, LC = dims["LN"], dims["LC"]
    LN_pad, LC_pad = dims["LN_pad"], dims["LC_pad"]
    assert d_num_in == d_num and x_cat.shape[1] == n_cat

    x_num = x_num.astype(jnp.float32)
    x_cat_shifted = (x_cat + category_offsets[None, :]).astype(jnp.int32)

    # ---- batch-tile sizing from a v7x-safe VMEM budget ----
    param_bytes = (d_num * LN_pad * 2 + 2 * LN_pad * 4          # rep + w_flat + b_num
                   + 3 * n_emb * LC_pad * 2 + LC_pad * 4)       # emb splits + b_cat
    per_row = (4 * (LN_pad + LC_pad) * 4          # output double-buffers + f32 accs/temps
               + 2 * (d_num + n_cat) * 4          # double-buffered input tiles
               + 4 * n_emb)                       # multi-hot / split temporaries
    avail = max(vmem_budget_bytes - param_bytes, 8 * per_row)
    TB = max(8, min(1024, int(avail // per_row)))
    if block_b is not None:
        TB = min(TB, max(8, int(block_b)))
    TB = (TB // 8) * 8                            # sublane multiple
    b8 = _round_up(B, 8)
    TB = min(TB, b8)
    if b8 >= 16:                                  # >=2 grid steps: keeps both v7x TCs busy
        TB = min(TB, _round_up(-(-B // 2), 8))
    TB = max(TB, 8)

    n_blocks = -(-B // TB)
    B_pad = n_blocks * TB
    if B_pad != B:
        # Pad with zeros (index 0 is a valid embedding row); extra rows are sliced off.
        x_num = jnp.pad(x_num, ((0, B_pad - B), (0, 0)))
        x_cat_shifted = jnp.pad(x_cat_shifted, ((0, B_pad - B), (0, 0)))

    est_vmem = param_bytes + TB * per_row
    vmem_limit = int(min(100 * 2 ** 20, max(32 * 2 ** 20, (est_vmem * 3) // 2)))

    kernel = _make_tokenizer_kernel(n_cat)
    out_dtype = jnp.asarray(weight).dtype

    def build(single_buffer_invariants):
        def inv_spec(shape):
            # Grid-invariant operands: single-buffered (no pipelining needed).
            if single_buffer_invariants:
                return pl.BlockSpec(shape, lambda i: (0, 0),
                                    pipeline_mode=pl.Buffered(1))
            return pl.BlockSpec(shape, lambda i: (0, 0))

        grid_spec = pltpu.PrefetchScalarGridSpec(
            num_scalar_prefetch=0,
            grid=(n_blocks,),
            in_specs=[
                pl.BlockSpec((TB, d_num), lambda i: (i, 0)),    # x_num batch tile
                pl.BlockSpec((TB, n_cat), lambda i: (i, 0)),    # x_cat batch tile
                inv_spec((d_num, LN_pad)),                      # rep (bf16 0/1)
                inv_spec((1, LN_pad)),                          # w_flat
                inv_spec((1, LN_pad)),                          # b_num
                inv_spec((n_emb, LC_pad)),                      # emb hi
                inv_spec((n_emb, LC_pad)),                      # emb mid
                inv_spec((n_emb, LC_pad)),                      # emb lo
                inv_spec((1, LC_pad)),                          # b_cat
            ],
            out_specs=[
                pl.BlockSpec((TB, LN_pad), lambda i: (i, 0)),   # numeric slab
                pl.BlockSpec((TB, LC_pad), lambda i: (i, 0)),   # categorical slab
            ],
        )
        return pl.pallas_call(
            kernel,
            out_shape=(jax.ShapeDtypeStruct((B_pad, LN_pad), out_dtype),
                       jax.ShapeDtypeStruct((B_pad, LC_pad), out_dtype)),
            grid_spec=grid_spec,
            compiler_params=pltpu.CompilerParams(
                dimension_semantics=("parallel",),
                vmem_limit_bytes=vmem_limit,
            ),
        )

    args = (x_num, x_cat_shifted, params["rep"], params["w_flat"], params["b_num"],
            params["m_hi"], params["m_mid"], params["m_lo"], params["b_cat"])
    try:
        out_num, out_cat = build(True)(*args)
    except Exception:   # fallback if this JAX build rejects Buffered(1) single-buffering
        out_num, out_cat = build(False)(*args)

    n_num1, d_token = dims["n_num1"], dims["d_token"]
    x_numtok = out_num[:B, :LN].reshape(B, n_num1, d_token)
    x_cattok = out_cat[:B, :LC].reshape(B, n_cat, d_token)
    return jnp.concatenate([x_numtok, x_cattok], axis=1)


def tokenizer_reference(x_num, x_cat, weight, emb_table, bias, category_offsets):
    """Pure-JAX reference mirroring the PyTorch forward."""
    B = x_num.shape[0]
    x_num_ext = jnp.concatenate([jnp.ones((B, 1), x_num.dtype), x_num], axis=1)
    x = weight[None] * x_num_ext[:, :, None]
    emb = emb_table[x_cat + category_offsets[None, :]]
    x = jnp.concatenate([x, emb], axis=1)
    if bias is not None:
        bias_ext = jnp.concatenate(
            [jnp.zeros((1, bias.shape[1]), bias.dtype), bias], axis=0
        )
        x = x + bias_ext[None]
    return x


if __name__ == "__main__":
    key = jax.random.PRNGKey(0)

    # Small shapes implied by the module: tabular batch with numerical + categorical cols.
    B = 2
    d_numerical = 4
    categories = [3, 5, 7]
    d_token = 32

    k_w, k_b, k_e, k_xn, k_xc = jax.random.split(key, 5)

    # kaiming_uniform_(a=sqrt(5)) on a 2-D (rows, d_token) tensor -> bound = 1/sqrt(d_token)
    bound = 1.0 / math.sqrt(d_token)
    weight = jax.random.uniform(
        k_w, (d_numerical + 1, d_token), jnp.float32, -bound, bound
    )
    bias = jax.random.uniform(
        k_b, (d_numerical + len(categories), d_token), jnp.float32, -bound, bound
    )
    emb_table = jax.random.uniform(
        k_e, (sum(categories), d_token), jnp.float32, -bound, bound
    )
    category_offsets = jnp.asarray(
        np.cumsum([0] + categories[:-1]), dtype=jnp.int32
    )  # [0, 3, 8]

    x_num = jax.random.normal(k_xn, (B, d_numerical), jnp.float32)
    x_cat = jnp.stack(
        [
            jax.random.randint(jax.random.fold_in(k_xc, i), (B,), 0, c)
            for i, c in enumerate(categories)
        ],
        axis=1,
    ).astype(jnp.int32)

    out = tokenizer_forward(x_num, x_cat, weight, emb_table, bias, category_offsets)
    out = jax.block_until_ready(out)

    ref = tokenizer_reference(x_num, x_cat, weight, emb_table, bias, category_offsets)
    assert out.shape == (B, 1 + d_numerical + len(categories), d_token), out.shape
    np.testing.assert_allclose(np.asarray(out), np.asarray(ref), rtol=1e-5, atol=1e-6)

    # Second config: exercise batch tiling + non-divisible batch (padding path).
    B2 = 10
    x_num2 = jax.random.normal(jax.random.fold_in(key, 7), (B2, d_numerical), jnp.float32)
    x_cat2 = jnp.stack(
        [
            jax.random.randint(jax.random.fold_in(key, 100 + i), (B2,), 0, c)
            for i, c in enumerate(categories)
        ],
        axis=1,
    ).astype(jnp.int32)
    out2 = jax.block_until_ready(
        tokenizer_forward(
            x_num2, x_cat2, weight, emb_table, bias, category_offsets, block_b=8
        )
    )
    ref2 = tokenizer_reference(x_num2, x_cat2, weight, emb_table, bias, category_offsets)
    np.testing.assert_allclose(np.asarray(out2), np.asarray(ref2), rtol=1e-5, atol=1e-6)

    print("KERNEL_OK")
</pallas_src>

<mosaic_0001>
module attributes {stable_mosaic.version = 11 : i64} {
  func.func @kernel(%arg0: i32, %arg1: memref<8x4xf32, #tpu.memory_space<vmem>>, %arg2: memref<8x3xi32, #tpu.memory_space<vmem>>, %arg3: memref<4x256xbf16, #tpu.memory_space<vmem>>, %arg4: memref<1x256xf32, #tpu.memory_space<vmem>>, %arg5: memref<1x256xf32, #tpu.memory_space<vmem>>, %arg6: memref<15x128xbf16, #tpu.memory_space<vmem>>, %arg7: memref<15x128xbf16, #tpu.memory_space<vmem>>, %arg8: memref<15x128xbf16, #tpu.memory_space<vmem>>, %arg9: memref<1x128xf32, #tpu.memory_space<vmem>>, %arg10: memref<8x256xf32, #tpu.memory_space<vmem>>, %arg11: memref<8x128xf32, #tpu.memory_space<vmem>>) attributes {dimension_semantics = [#tpu.dimension_semantics<parallel>], iteration_bounds = array<i64: 1>, scalar_prefetch = 0 : i64, scratch_operands = 0 : i64, tpu.core_type = #tpu.core_type<tc>, window_params = [{transform_indices = @transform_0, window_bounds = array<i64: 8, 4>}, {transform_indices = @transform_1, window_bounds = array<i64: 8, 3>}, {pipeline_mode = #tpu.pipeline_mode<synchronous>, transform_indices = @transform_2, window_bounds = array<i64: 4, 256>}, {pipeline_mode = #tpu.pipeline_mode<synchronous>, transform_indices = @transform_3, window_bounds = array<i64: 1, 256>}, {pipeline_mode = #tpu.pipeline_mode<synchronous>, transform_indices = @transform_4, window_bounds = array<i64: 1, 256>}, {pipeline_mode = #tpu.pipeline_mode<synchronous>, transform_indices = @transform_5, window_bounds = array<i64: 15, 128>}, {pipeline_mode = #tpu.pipeline_mode<synchronous>, transform_indices = @transform_6, window_bounds = array<i64: 15, 128>}, {pipeline_mode = #tpu.pipeline_mode<synchronous>, transform_indices = @transform_7, window_bounds = array<i64: 15, 128>}, {pipeline_mode = #tpu.pipeline_mode<synchronous>, transform_indices = @transform_8, window_bounds = array<i64: 1, 128>}, {transform_indices = @transform_9, window_bounds = array<i64: 8, 256>}, {transform_indices = @transform_10, window_bounds = array<i64: 8, 128>}]} {
    %c0 = arith.constant 0 : index
    %c0_0 = arith.constant 0 : index
    %0 = vector.load %arg1[%c0, %c0_0] : memref<8x4xf32, #tpu.memory_space<vmem>>, vector<8x4xf32>
    %1 = arith.truncf %0 : vector<8x4xf32> to vector<8x4xbf16>
    %2 = arith.extf %1 : vector<8x4xbf16> to vector<8x4xf32>
    %3 = arith.subf %0, %2 : vector<8x4xf32>
    %4 = arith.truncf %3 : vector<8x4xf32> to vector<8x4xbf16>
    %5 = arith.extf %4 : vector<8x4xbf16> to vector<8x4xf32>
    %6 = arith.subf %3, %5 : vector<8x4xf32>
    %7 = arith.truncf %6 : vector<8x4xf32> to vector<8x4xbf16>
    %c0_1 = arith.constant 0 : index
    %c0_2 = arith.constant 0 : index
    %8 = vector.load %arg3[%c0_1, %c0_2] : memref<4x256xbf16, #tpu.memory_space<vmem>>, vector<4x256xbf16>
    %cst = arith.constant dense<0.000000e+00> : vector<8x256xf32>
    %9 = tpu.matmul %1, %8, %cst {dimension_numbers = #tpu.dot_dimension_numbers<[1], [0], [0], [1], [0, 0, 1, 1], [], []>} : vector<8x4xbf16>, vector<4x256xbf16>, vector<8x256xf32> -> vector<8x256xf32>
    %cst_3 = arith.constant dense<0.000000e+00> : vector<8x256xf32>
    %10 = tpu.matmul %4, %8, %cst_3 {dimension_numbers = #tpu.dot_dimension_numbers<[1], [0], [0], [1], [0, 0, 1, 1], [], []>} : vector<8x4xbf16>, vector<4x256xbf16>, vector<8x256xf32> -> vector<8x256xf32>
    %11 = arith.addf %9, %10 : vector<8x256xf32>
    %cst_4 = arith.constant dense<0.000000e+00> : vector<8x256xf32>
    %12 = tpu.matmul %7, %8, %cst_4 {dimension_numbers = #tpu.dot_dimension_numbers<[1], [0], [0], [1], [0, 0, 1, 1], [], []>} : vector<8x4xbf16>, vector<4x256xbf16>, vector<8x256xf32> -> vector<8x256xf32>
    %13 = arith.addf %11, %12 : vector<8x256xf32>
    %c0_5 = arith.constant 0 : index
    %c0_6 = arith.constant 0 : index
    %14 = vector.load %arg4[%c0_5, %c0_6] : memref<1x256xf32, #tpu.memory_space<vmem>>, vector<1x256xf32>
    %15 = vector.broadcast %14 : vector<1x256xf32> to vector<8x256xf32>
    %16 = arith.mulf %13, %15 : vector<8x256xf32>
    %c0_7 = arith.constant 0 : index
    %c0_8 = arith.constant 0 : index
    %17 = vector.load %arg5[%c0_7, %c0_8] : memref<1x256xf32, #tpu.memory_space<vmem>>, vector<1x256xf32>
    %18 = vector.broadcast %17 : vector<1x256xf32> to vector<8x256xf32>
    %19 = arith.addf %16, %18 : vector<8x256xf32>
    %c0_9 = arith.constant 0 : index
    %c0_10 = arith.constant 0 : index
    %20 = vector.load %arg10[%c0_9, %c0_10] : memref<8x256xf32, #tpu.memory_space<vmem>>, vector<8x256xf32>
    tpu.vector_store %arg10[%c0_9, %c0_10], %19 {strides = array<i32>} : memref<8x256xf32, #tpu.memory_space<vmem>>, vector<8x256xf32>,
    %c0_11 = arith.constant 0 : index
    %c0_12 = arith.constant 0 : index
    %21 = vector.load %arg2[%c0_11, %c0_12] : memref<8x3xi32, #tpu.memory_space<vmem>>, vector<8x3xi32>
    %22 = tpu.iota {dimensions = array<i32: 1>} : vector<8x15xi32>
    %cst_13 = arith.constant 0.000000e+00 : bf16
    %23 = vector.broadcast %cst_13 : bf16 to vector<8x15xbf16>
    %24 = vector.extract_strided_slice %21 {offsets = [0, 0], sizes = [8, 1], strides = [1, 1]} : vector<8x3xi32> to vector<8x1xi32>
    %25 = vector.broadcast %24 : vector<8x1xi32> to vector<8x15xi32>
    %26 = arith.cmpi eq, %22, %25 : vector<8x15xi32>
    %27 = arith.extui %26 : vector<8x15xi1> to vector<8x15xi32>
    %28 = arith.sitofp %27 : vector<8x15xi32> to vector<8x15xf32>
    %29 = arith.truncf %28 : vector<8x15xf32> to vector<8x15xbf16>
    %30 = arith.addf %23, %29 : vector<8x15xbf16>
    %31 = vector.extract_strided_slice %21 {offsets = [0, 1], sizes = [8, 1], strides = [1, 1]} : vector<8x3xi32> to vector<8x1xi32>
    %32 = vector.broadcast %31 : vector<8x1xi32> to vector<8x15xi32>
    %33 = arith.cmpi eq, %22, %32 : vector<8x15xi32>
    %34 = arith.extui %33 : vector<8x15xi1> to vector<8x15xi32>
    %35 = arith.sitofp %34 : vector<8x15xi32> to vector<8x15xf32>
    %36 = arith.truncf %35 : vector<8x15xf32> to vector<8x15xbf16>
    %37 = arith.addf %30, %36 : vector<8x15xbf16>
    %38 = vector.extract_strided_slice %21 {offsets = [0, 2], sizes = [8, 1], strides = [1, 1]} : vector<8x3xi32> to vector<8x1xi32>
    %39 = vector.broadcast %38 : vector<8x1xi32> to vector<8x15xi32>
    %40 = arith.cmpi eq, %22, %39 : vector<8x15xi32>
    %41 = arith.extui %40 : vector<8x15xi1> to vector<8x15xi32>
    %42 = arith.sitofp %41 : vector<8x15xi32> to vector<8x15xf32>
    %43 = arith.truncf %42 : vector<8x15xf32> to vector<8x15xbf16>
    %44 = arith.addf %37, %43 : vector<8x15xbf16>
    %c0_14 = arith.constant 0 : index
    %c0_15 = arith.constant 0 : index
    %45 = vector.load %arg6[%c0_14, %c0_15] : memref<15x128xbf16, #tpu.memory_space<vmem>>, vector<15x128xbf16>
    %cst_16 = arith.constant dense<0.000000e+00> : vector<8x128xf32>
    %46 = tpu.matmul %44, %45, %cst_16 {dimension_numbers = #tpu.dot_dimension_numbers<[1], [0], [0], [1], [0, 0, 1, 1], [], []>} : vector<8x15xbf16>, vector<15x128xbf16>, vector<8x128xf32> -> vector<8x128xf32>
    %c0_17 = arith.constant 0 : index
    %c0_18 = arith.constant 0 : index
    %47 = vector.load %arg7[%c0_17, %c0_18] : memref<15x128xbf16, #tpu.memory_space<vmem>>, vector<15x128xbf16>
    %cst_19 = arith.constant dense<0.000000e+00> : vector<8x128xf32>
    %48 = tpu.matmul %44, %47, %cst_19 {dimension_numbers = #tpu.dot_dimension_numbers<[1], [0], [0], [1], [0, 0, 1, 1], [], []>} : vector<8x15xbf16>, vector<15x128xbf16>, vector<8x128xf32> -> vector<8x128xf32>
    %49 = arith.addf %46, %48 : vector<8x128xf32>
    %c0_20 = arith.constant 0 : index
    %c0_21 = arith.constant 0 : index
    %50 = vector.load %arg8[%c0_20, %c0_21] : memref<15x128xbf16, #tpu.memory_space<vmem>>, vector<15x128xbf16>
    %cst_22 = arith.constant dense<0.000000e+00> : vector<8x128xf32>
    %51 = tpu.matmul %44, %50, %cst_22 {dimension_numbers = #tpu.dot_dimension_numbers<[1], [0], [0], [1], [0, 0, 1, 1], [], []>} : vector<8x15xbf16>, vector<15x128xbf16>, vector<8x128xf32> -> vector<8x128xf32>
    %52 = arith.addf %49, %51 : vector<8x128xf32>
    %c0_23 = arith.constant 0 : index
    %c0_24 = arith.constant 0 : index
    %53 = vector.load %arg9[%c0_23, %c0_24] : memref<1x128xf32, #tpu.memory_space<vmem>>, vector<1x128xf32>
    %54 = vector.broadcast %53 : vector<1x128xf32> to vector<8x128xf32>
    %55 = arith.addf %52, %54 : vector<8x128xf32>
    %c0_25 = arith.constant 0 : index
    %c0_26 = arith.constant 0 : index
    %56 = vector.load %arg11[%c0_25, %c0_26] : memref<8x128xf32, #tpu.memory_space<vmem>>, vector<8x128xf32>
    tpu.vector_store %arg11[%c0_25, %c0_26], %55 {strides = array<i32>} : memref<8x128xf32, #tpu.memory_space<vmem>>, vector<8x128xf32>,
    return
  }
  func.func @transform_0(%arg0: i32) -> (i32, i32) {
    %c0_i32 = arith.constant 0 : i32
    %c0_i32_0 = arith.constant 0 : i32
    return %arg0, %c0_i32 : i32, i32
  }
  func.func @transform_1(%arg0: i32) -> (i32, i32) {
    %c0_i32 = arith.constant 0 : i32
    %c0_i32_0 = arith.constant 0 : i32
    return %arg0, %c0_i32 : i32, i32
  }
  func.func @transform_2(%arg0: i32) -> (i32, i32) {
    %c0_i32 = arith.constant 0 : i32
    %c0_i32_0 = arith.constant 0 : i32
    %c0_i32_1 = arith.constant 0 : i32
    return %c0_i32, %c0_i32_0 : i32, i32
  }
  func.func @transform_3(%arg0: i32) -> (i32, i32) {
    %c0_i32 = arith.constant 0 : i32
    %c0_i32_0 = arith.constant 0 : i32
    %c0_i32_1 = arith.constant 0 : i32
    return %c0_i32, %c0_i32_0 : i32, i32
  }
  func.func @transform_4(%arg0: i32) -> (i32, i32) {
    %c0_i32 = arith.constant 0 : i32
    %c0_i32_0 = arith.constant 0 : i32
    %c0_i32_1 = arith.constant 0 : i32
    return %c0_i32, %c0_i32_0 : i32, i32
  }
  func.func @transform_5(%arg0: i32) -> (i32, i32) {
    %c0_i32 = arith.constant 0 : i32
    %c0_i32_0 = arith.constant 0 : i32
    %c0_i32_1 = arith.constant 0 : i32
    return %c0_i32, %c0_i32_0 : i32, i32
  }
  func.func @transform_6(%arg0: i32) -> (i32, i32) {
    %c0_i32 = arith.constant 0 : i32
    %c0_i32_0 = arith.constant 0 : i32
    %c0_i32_1 = arith.constant 0 : i32
    return %c0_i32, %c0_i32_0 : i32, i32
  }
  func.func @transform_7(%arg0: i32) -> (i32, i32) {
    %c0_i32 = arith.constant 0 : i32
    %c0_i32_0 = arith.constant 0 : i32
    %c0_i32_1 = arith.constant 0 : i32
    return %c0_i32, %c0_i32_0 : i32, i32
  }
  func.func @transform_8(%arg0: i32) -> (i32, i32) {
    %c0_i32 = arith.constant 0 : i32
    %c0_i32_0 = arith.constant 0 : i32
    %c0_i32_1 = arith.constant 0 : i32
    return %c0_i32, %c0_i32_0 : i32, i32
  }
  func.func @transform_9(%arg0: i32) -> (i32, i32) {
    %c0_i32 = arith.constant 0 : i32
    %c0_i32_0 = arith.constant 0 : i32
    return %arg0, %c0_i32 : i32, i32
  }
  func.func @transform_10(%arg0: i32) -> (i32, i32) {
    %c0_i32 = arith.constant 0 : i32
    %c0_i32_0 = arith.constant 0 : i32
    return %arg0, %c0_i32 : i32, i32
  }
}

module attributes {stable_mosaic.version = 11 : i64} {
  func.func @kernel(%arg0: i32, %arg1: memref<8x4xf32, #tpu.memory_space<vmem>>, %arg2: memref<8x3xi32, #tpu.memory_space<vmem>>, %arg3: memref<4x256xbf16, #tpu.memory_space<vmem>>, %arg4: memref<1x256xf32, #tpu.memory_space<vmem>>, %arg5: memref<1x256xf32, #tpu.memory_space<vmem>>, %arg6: memref<15x128xbf16, #tpu.memory_space<vmem>>, %arg7: memref<15x128xbf16, #tpu.memory_space<vmem>>, %arg8: memref<15x128xbf16, #tpu.memory_space<vmem>>, %arg9: memref<1x128xf32, #tpu.memory_space<vmem>>, %arg10: memref<8x256xf32, #tpu.memory_space<vmem>>, %arg11: memref<8x128xf32, #tpu.memory_space<vmem>>) attributes {dimension_semantics = [#tpu.dimension_semantics<parallel>], iteration_bounds = array<i64: 1>, scalar_prefetch = 0 : i64, scratch_operands = 0 : i64, tpu.core_type = #tpu.core_type<tc>, window_params = [{transform_indices = @transform_0, window_bounds = array<i64: 8, 4>}, {transform_indices = @transform_1, window_bounds = array<i64: 8, 3>}, {pipeline_mode = #tpu.pipeline_mode<synchronous>, transform_indices = @transform_2, window_bounds = array<i64: 4, 256>}, {pipeline_mode = #tpu.pipeline_mode<synchronous>, transform_indices = @transform_3, window_bounds = array<i64: 1, 256>}, {pipeline_mode = #tpu.pipeline_mode<synchronous>, transform_indices = @transform_4, window_bounds = array<i64: 1, 256>}, {pipeline_mode = #tpu.pipeline_mode<synchronous>, transform_indices = @transform_5, window_bounds = array<i64: 15, 128>}, {pipeline_mode = #tpu.pipeline_mode<synchronous>, transform_indices = @transform_6, window_bounds = array<i64: 15, 128>}, {pipeline_mode = #tpu.pipeline_mode<synchronous>, transform_indices = @transform_7, window_bounds = array<i64: 15, 128>}, {pipeline_mode = #tpu.pipeline_mode<synchronous>, transform_indices = @transform_8, window_bounds = array<i64: 1, 128>}, {transform_indices = @transform_9, window_bounds = array<i64: 8, 256>}, {transform_indices = @transform_10, window_bounds = array<i64: 8, 128>}]} {
    %c0 = arith.constant 0 : index
    %c0_0 = arith.constant 0 : index
    %0 = vector.load %arg1[%c0, %c0_0] : memref<8x4xf32, #tpu.memory_space<vmem>>, vector<8x4xf32>
    %1 = arith.truncf %0 : vector<8x4xf32> to vector<8x4xbf16>
    %2 = arith.extf %1 : vector<8x4xbf16> to vector<8x4xf32>
    %3 = arith.subf %0, %2 : vector<8x4xf32>
    %4 = arith.truncf %3 : vector<8x4xf32> to vector<8x4xbf16>
    %5 = arith.extf %4 : vector<8x4xbf16> to vector<8x4xf32>
    %6 = arith.subf %3, %5 : vector<8x4xf32>
    %7 = arith.truncf %6 : vector<8x4xf32> to vector<8x4xbf16>
    %c0_1 = arith.constant 0 : index
    %c0_2 = arith.constant 0 : index
    %8 = vector.load %arg3[%c0_1, %c0_2] : memref<4x256xbf16, #tpu.memory_space<vmem>>, vector<4x256xbf16>
    %cst = arith.constant dense<0.000000e+00> : vector<8x256xf32>
    %9 = tpu.matmul %1, %8, %cst {dimension_numbers = #tpu.dot_dimension_numbers<[1], [0], [0], [1], [0, 0, 1, 1], [], []>} : vector<8x4xbf16>, vector<4x256xbf16>, vector<8x256xf32> -> vector<8x256xf32>
    %cst_3 = arith.constant dense<0.000000e+00> : vector<8x256xf32>
    %10 = tpu.matmul %4, %8, %cst_3 {dimension_numbers = #tpu.dot_dimension_numbers<[1], [0], [0], [1], [0, 0, 1, 1], [], []>} : vector<8x4xbf16>, vector<4x256xbf16>, vector<8x256xf32> -> vector<8x256xf32>
    %11 = arith.addf %9, %10 : vector<8x256xf32>
    %cst_4 = arith.constant dense<0.000000e+00> : vector<8x256xf32>
    %12 = tpu.matmul %7, %8, %cst_4 {dimension_numbers = #tpu.dot_dimension_numbers<[1], [0], [0], [1], [0, 0, 1, 1], [], []>} : vector<8x4xbf16>, vector<4x256xbf16>, vector<8x256xf32> -> vector<8x256xf32>
    %13 = arith.addf %11, %12 : vector<8x256xf32>
    %c0_5 = arith.constant 0 : index
    %c0_6 = arith.constant 0 : index
    %14 = vector.load %arg4[%c0_5, %c0_6] : memref<1x256xf32, #tpu.memory_space<vmem>>, vector<1x256xf32>
    %15 = vector.broadcast %14 : vector<1x256xf32> to vector<8x256xf32>
    %16 = arith.mulf %13, %15 : vector<8x256xf32>
    %c0_7 = arith.constant 0 : index
    %c0_8 = arith.constant 0 : index
    %17 = vector.load %arg5[%c0_7, %c0_8] : memref<1x256xf32, #tpu.memory_space<vmem>>, vector<1x256xf32>
    %18 = vector.broadcast %17 : vector<1x256xf32> to vector<8x256xf32>
    %19 = arith.addf %16, %18 : vector<8x256xf32>
    %c0_9 = arith.constant 0 : index
    %c0_10 = arith.constant 0 : index
    %20 = vector.load %arg10[%c0_9, %c0_10] : memref<8x256xf32, #tpu.memory_space<vmem>>, vector<8x256xf32>
    tpu.vector_store %arg10[%c0_9, %c0_10], %19 {strides = array<i32>} : memref<8x256xf32, #tpu.memory_space<vmem>>, vector<8x256xf32>,
    %c0_11 = arith.constant 0 : index
    %c0_12 = arith.constant 0 : index
    %21 = vector.load %arg2[%c0_11, %c0_12] : memref<8x3xi32, #tpu.memory_space<vmem>>, vector<8x3xi32>
    %22 = tpu.iota {dimensions = array<i32: 1>} : vector<8x15xi32>
    %cst_13 = arith.constant 0.000000e+00 : bf16
    %23 = vector.broadcast %cst_13 : bf16 to vector<8x15xbf16>
    %24 = vector.extract_strided_slice %21 {offsets = [0, 0], sizes = [8, 1], strides = [1, 1]} : vector<8x3xi32> to vector<8x1xi32>
    %25 = vector.broadcast %24 : vector<8x1xi32> to vector<8x15xi32>
    %26 = arith.cmpi eq, %22, %25 : vector<8x15xi32>
    %27 = arith.extui %26 : vector<8x15xi1> to vector<8x15xi32>
    %28 = arith.sitofp %27 : vector<8x15xi32> to vector<8x15xf32>
    %29 = arith.truncf %28 : vector<8x15xf32> to vector<8x15xbf16>
    %30 = arith.addf %23, %29 : vector<8x15xbf16>
    %31 = vector.extract_strided_slice %21 {offsets = [0, 1], sizes = [8, 1], strides = [1, 1]} : vector<8x3xi32> to vector<8x1xi32>
    %32 = vector.broadcast %31 : vector<8x1xi32> to vector<8x15xi32>
    %33 = arith.cmpi eq, %22, %32 : vector<8x15xi32>
    %34 = arith.extui %33 : vector<8x15xi1> to vector<8x15xi32>
    %35 = arith.sitofp %34 : vector<8x15xi32> to vector<8x15xf32>
    %36 = arith.truncf %35 : vector<8x15xf32> to vector<8x15xbf16>
    %37 = arith.addf %30, %36 : vector<8x15xbf16>
    %38 = vector.extract_strided_slice %21 {offsets = [0, 2], sizes = [8, 1], strides = [1, 1]} : vector<8x3xi32> to vector<8x1xi32>
    %39 = vector.broadcast %38 : vector<8x1xi32> to vector<8x15xi32>
    %40 = arith.cmpi eq, %22, %39 : vector<8x15xi32>
    %41 = arith.extui %40 : vector<8x15xi1> to vector<8x15xi32>
    %42 = arith.sitofp %41 : vector<8x15xi32> to vector<8x15xf32>
    %43 = arith.truncf %42 : vector<8x15xf32> to vector<8x15xbf16>
    %44 = arith.addf %37, %43 : vector<8x15xbf16>
    %c0_14 = arith.constant 0 : index
    %c0_15 = arith.constant 0 : index
    %45 = vector.load %arg6[%c0_14, %c0_15] : memref<15x128xbf16, #tpu.memory_space<vmem>>, vector<15x128xbf16>
    %cst_16 = arith.constant dense<0.000000e+00> : vector<8x128xf32>
    %46 = tpu.matmul %44, %45, %cst_16 {dimension_numbers = #tpu.dot_dimension_numbers<[1], [0], [0], [1], [0, 0, 1, 1], [], []>} : vector<8x15xbf16>, vector<15x128xbf16>, vector<8x128xf32> -> vector<8x128xf32>
    %c0_17 = arith.constant 0 : index
    %c0_18 = arith.constant 0 : index
    %47 = vector.load %arg7[%c0_17, %c0_18] : memref<15x128xbf16, #tpu.memory_space<vmem>>, vector<15x128xbf16>
    %cst_19 = arith.constant dense<0.000000e+00> : vector<8x128xf32>
    %48 = tpu.matmul %44, %47, %cst_19 {dimension_numbers = #tpu.dot_dimension_numbers<[1], [0], [0], [1], [0, 0, 1, 1], [], []>} : vector<8x15xbf16>, vector<15x128xbf16>, vector<8x128xf32> -> vector<8x128xf32>
    %49 = arith.addf %46, %48 : vector<8x128xf32>
    %c0_20 = arith.constant 0 : index
    %c0_21 = arith.constant 0 : index
    %50 = vector.load %arg8[%c0_20, %c0_21] : memref<15x128xbf16, #tpu.memory_space<vmem>>, vector<15x128xbf16>
    %cst_22 = arith.constant dense<0.000000e+00> : vector<8x128xf32>
    %51 = tpu.matmul %44, %50, %cst_22 {dimension_numbers = #tpu.dot_dimension_numbers<[1], [0], [0], [1], [0, 0, 1, 1], [], []>} : vector<8x15xbf16>, vector<15x128xbf16>, vector<8x128xf32> -> vector<8x128xf32>
    %52 = arith.addf %49, %51 : vector<8x128xf32>
    %c0_23 = arith.constant 0 : index
    %c0_24 = arith.constant 0 : index
    %53 = vector.load %arg9[%c0_23, %c0_24] : memref<1x128xf32, #tpu.memory_space<vmem>>, vector<1x128xf32>
    %54 = vector.broadcast %53 : vector<1x128xf32> to vector<8x128xf32>
    %55 = arith.addf %52, %54 : vector<8x128xf32>
    %c0_25 = arith.constant 0 : index
    %c0_26 = arith.constant 0 : index
    %56 = vector.load %arg11[%c0_25, %c0_26] : memref<8x128xf32, #tpu.memory_space<vmem>>, vector<8x128xf32>
    tpu.vector_store %arg11[%c0_25, %c0_26], %55 {strides = array<i32>} : memref<8x128xf32, #tpu.memory_space<vmem>>, vector<8x128xf32>,
    return
  }
  func.func @transform_0(%arg0: i32) -> (i32, i32) {
    %c0_i32 = arith.constant 0 : i32
    %c0_i32_0 = arith.constant 0 : i32
    return %arg0, %c0_i32 : i32, i32
  }
  func.func @transform_1(%arg0: i32) -> (i32, i32) {
    %c0_i32 = arith.constant 0 : i32
    %c0_i32_0 = arith.constant 0 : i32
    return %arg0, %c0_i32 : i32, i32
  }
  func.func @transform_2(%arg0: i32) -> (i32, i32) {
    %c0_i32 = arith.constant 0 : i32
    %c0_i32_0 = arith.constant 0 : i32
    %c0_i32_1 = arith.constant 0 : i32
    return %c0_i32, %c0_i32_0 : i32, i32
  }
  func.func @transform_3(%arg0: i32) -> (i32, i32) {
    %c0_i32 = arith.constant 0 : i32
    %c0_i32_0 = arith.constant 0 : i32
    %c0_i32_1 = arith.constant 0 : i32
    return %c0_i32, %c0_i32_0 : i32, i32
  }
  func.func @transform_4(%arg0: i32) -> (i32, i32) {
    %c0_i32 = arith.constant 0 : i32
    %c0_i32_0 = arith.constant 0 : i32
    %c0_i32_1 = arith.constant 0 : i32
    return %c0_i32, %c0_i32_0 : i32, i32
  }
  func.func @transform_5(%arg0: i32) -> (i32, i32) {
    %c0_i32 = arith.constant 0 : i32
    %c0_i32_0 = arith.constant 0 : i32
    %c0_i32_1 = arith.constant 0 : i32
    return %c0_i32, %c0_i32_0 : i32, i32
  }
  func.func @transform_6(%arg0: i32) -> (i32, i32) {
    %c0_i32 = arith.constant 0 : i32
    %c0_i32_0 = arith.constant 0 : i32
    %c0_i32_1 = arith.constant 0 : i32
    return %c0_i32, %c0_i32_0 : i32, i32
  }
  func.func @transform_7(%arg0: i32) -> (i32, i32) {
    %c0_i32 = arith.constant 0 : i32
    %c0_i32_0 = arith.constant 0 : i32
    %c0_i32_1 = arith.constant 0 : i32
    return %c0_i32, %c0_i32_0 : i32, i32
  }
  func.func @transform_8(%arg0: i32) -> (i32, i32) {
    %c0_i32 = arith.constant 0 : i32
    %c0_i32_0 = arith.constant 0 : i32
    %c0_i32_1 = arith.constant 0 : i32
    return %c0_i32, %c0_i32_0 : i32, i32
  }
  func.func @transform_9(%arg0: i32) -> (i32, i32) {
    %c0_i32 = arith.constant 0 : i32
    %c0_i32_0 = arith.constant 0 : i32
    return %arg0, %c0_i32 : i32, i32
  }
  func.func @transform_10(%arg0: i32) -> (i32, i32) {
    %c0_i32 = arith.constant 0 : i32
    %c0_i32_0 = arith.constant 0 : i32
    return %arg0, %c0_i32 : i32, i32
  }
}

</mosaic_0001>

<bundles_post_ra>
// kernel: tpu_custom_call.1
= control target key start
LH: loop header
LB: loop body
LE: loop exit
PB: predicated region body
PF: predicated region fallthrough
CT: control target
= control target key end

     0   :  { %16 = vsyncpa [#allocation3], 0  ;;  %vm59_vm0 = vcmask 1041408   ;;  %v562_v2 = vmov 0   ;;  %v563_v3 = vmov 2   ;;  %v564_v9 = vmov 0.0   ;;  %s695_s0 = inlined_call_operand.vmem [shape: f32[8,4], index: 0, kind: input, shape index: {}]   ;;  %s696_s1 = inlined_call_operand.vmem [shape: s32[8,3], index: 1, kind: input, shape index: {}]   ;;  %s697_s2 = inlined_call_operand.vmem [shape: bf16[4,256], index: 2, kind: input, shape index: {}]   ;;  %s698_s3 = inlined_call_operand.vmem [shape: f32[1,256], index: 3, kind: input, shape index: {}]   ;;  %s699_s4 = inlined_call_operand.vmem [shape: f32[1,256], index: 4, kind: input, shape index: {}]   ;;  %s700_s5 = inlined_call_operand.vmem [shape: bf16[15,128], index: 5, kind: input, shape index: {}]   ;;  %s701_s6 = inlined_call_operand.vmem [shape: bf16[15,128], index: 6, kind: input, shape index: {}]   ;;  %s702_s7 = inlined_call_operand.vmem [shape: bf16[15,128], index: 7, kind: input, shape index: {}]   ;;  %s703_s8 = inlined_call_operand.vmem [shape: f32[1,128], index: 8, kind: input, shape index: {}]   ;;  %s704_s9 = inlined_call_operand.hbm [shape: f32[8,256], index: 9, kind: output, shape index: {0}]   ;;  %s705_s10 = inlined_call_operand.hbm [shape: f32[8,128], index: 10, kind: output, shape index: {1}]  }
   0x1   :  { %v227_v0 = vld [vmem:[%s696_s1] sm:$0xff]  ;;  %507 = vset.pattern.permute.xlu0 %v562_v2  ;;  %509 = vset.pattern.permute.xlu1 %v563_v3 }
   0x2   :  { %v37_v1 = vld [vmem:[%s695_s0] sm:$0xff]  ;;  %231 = vperm.xlu0 %507, %v227_v0   ;;  %247 = vperm.xlu1 %509, %v227_v0  }
   0x3   :  { %v450_v4 = vld.sshfl [vmem:[%s697_s2] sm:$0x33 pattern:$0x76325410]  ;;  %v38_v5 = vpack.c.bf16 %v37_v1, %v37_v1  ;;  %98 = vmatprep.mubr.bf16.mxu0 %v562_v2  ;;  %473 = vmatprep.subr.bf16.mxu1 %v564_v9 }
   0x4   :  { %v54_v6 = vcombine.high %v450_v4, %v450_v4  ;;  %v61_v7 = vsel %vm59_vm0, %v450_v4, 0 }
   0x5   :  { %v39_v8 = vunpack.c.l.bf16 %v38_v5 }
   0x6   :  { %451 = vmatprep.subr.msk.bf16.mxu0 %vm59_vm0, %v54_v6 }
   0x7   :  { %17 = vsyncpa [#allocation5], 0  ;;  %67 = vmatpush1.bf16.msra.mxu0 %v61_v7  ;;  %v40_v10 = vsub.f32 %v37_v1, %v39_v8  ;;  %v565_v11 = vmov 1   ;;  %vm55_vm1 = vcmask 31744   ;;  %vm267_vm2 = vcmask 1046528   ;;  %v511_v13 = vld [vmem:[%s701_s6] sm:$0xff]  }
   0x8   :  { %508 = vset.pattern.permute.xlu0 %v565_v11  ;;  %453 = vmatprep.subr.msk.bf16.mxu0 %vm59_vm0, %v54_v6  ;;  %vm268_vm3 = vcmask 1047552   ;;  %v566_v14 = vmov 65535   ;;  %vm567_vm4 = vmmov 0   ;;  %v199_v21 = vlaneseq  ;;  %v512_v30 = vld [vmem:[%s700_s5] sm:$0xff]   ;;  %s568_s23 = smov [#allocation2]  }
   0x9   :  { %239 = vperm.xlu0 %508, %v227_v0   ;;  %v41_v12 = vpack.c.bf16 %v40_v10, %v40_v10  ;;  %v269_v15 = vsel %vm267_vm2, 4294967295, %v566_v14  ;;  %475 = vmatprep.mubr.msk.bf16.mxu1 %vm567_vm4, %v564_v9  ;;  %vm263_vm8 = vcmask 121856   ;;  %v513_v37 = vld [vmem:[%s702_s7] sm:$0xff]   ;;  %s428_s24 = sshll.u32 %s568_s23, 4  ;;  %s429_s24 = int_to_ptr.vmem [resolvable:$true] %s428_s24 }
   0xa   :  { %v270_v16 = vsel %vm268_vm3, %v269_v15, 0  ;;  %v229_v22 = vand.u32 127, %v199_v21  ;;  %v200_v39 = vshrl.u32 %v199_v21, 7  ;;  %v197_v41 = vld [vmem:[%s698_s3] sm:$0x3]  ;;  %s514_s3 = scalar_lea.vmem %s429_s24, 256  ;;  %p519_p1 = scmp.lt.s32.totalorder %s429_s24, %s429_s24 }
   0xb   :  { %452 = vmatmul.mubr.msk.bf16.vlgmr.msra.gmra.mrb[0].mxu0 %vm55_vm1, %v41_v12  ;;  %v272_v17 = vand.u32 %v511_v13, %v270_v16  ;;  %v42_v18 = vunpack.c.l.bf16 %v41_v12  ;;  %v320_v35 = vand.u32 %v512_v30, %v270_v16  ;;  %v370_v38 = vand.u32 %v513_v37, %v270_v16  ;;  %v211_v43 = vld [vmem:[%s699_s4] sm:$0x3]  ;;  %p515_p0 = scmp.ne.s32.totalorder %s429_s24, %s514_s3  ;;  %p520_p2 = scmp.lt.s32.totalorder %s514_s3, %s514_s3 }
   0xc   :  { %111 = vmatpush1.bf16.msra.mxu0 %v61_v7  ;;  %142 = vmatprep.mubr.bf16.mxu0 %v562_v2  ;;  %v201_v40 = vsub.s32 0, %v200_v39  ;;  %v205_v42 = vsub.s32 1, %v200_v39 }
   0xd   :  { %455 = vmatprep.subr.msk.bf16.mxu0 %vm59_vm0, %v54_v6  ;;  %510 = vset.pattern.permute.xlu0 %v563_v3  ;;  %v43_v19 = vsub.f32 %v40_v10, %v42_v18  ;;  %p521_p3 = por %p520_p2, %p519_p1 }
   0xe   :  { %474 = vmatpush3.bf16.msra.mxu1 %v272_v17  ;;  %v202_v44 = vrot.slane %v197_v41, %v201_v40  ;;  %v206_v45 = vrot.slane %v197_v41, %v205_v42  ;;  %v216_v46 = vrot.slane %v211_v43, %v201_v40  ;;  %v220_v48 = vrot.slane %v211_v43, %v205_v42 }
   0xf   :  { %479 = vmatprep.subr.bf16.mxu1 %v564_v9  ;;  %v44_v20 = vpack.c.bf16 %v43_v19, %v43_v19  ;;  %p522_p4 = pnand %p521_p3, %p515_p0 }
  0x17   :  { %454 = vmatmul.mubr.msk.bf16.vlgmr.msra.gmra.mrb[0].mxu0 %vm55_vm1, %v38_v5 }
  0x18   :  { %155 = vmatpush1.bf16.msra.mxu0 %v61_v7  ;;  %186 = vmatprep.mubr.bf16.mxu0 %v562_v2 }
  0x23   :  { %456 = vmatmul.mubr.msk.bf16.vlgmr.msra.gmra.mrb[0].mxu0 %vm55_vm1, %v44_v20 }
  0x81   :  { %v232_v23 = vpop.permute.xlu0 %231  ;;  %v248_v24 = vpop.permute.xlu1 %247 }
  0x82   :  { %vm233_vm5 = vcmp.eq.s32.totalorder %v229_v22, %v232_v23  ;;  %vm249_vm6 = vcmp.eq.s32.totalorder %v229_v22, %v248_v24 }
  0x83   :  { %v457_v25 = vsel %vm233_vm5, 1.0, %v564_v9  ;;  %v459_v28 = vsel %vm249_vm6, 1.0, %v564_v9 }
  0x84   :  { %v236_v26 = vpack.c.bf16 %v457_v25, %v457_v25  ;;  %v252_v33 = vpack.c.bf16 %v459_v28, %v459_v28 }
  0x86   :  { %v237_v31 = vadd.bf16 0, %v236_v26 }
  0x88   :  { %v240_v27 = vpop.permute.xlu0 %239 }
  0x89   :  { %vm241_vm7 = vcmp.eq.s32.totalorder %v229_v22, %v240_v27 }
  0x8a   :  { %v458_v29 = vsel %vm241_vm7, 1.0, %v564_v9 }
  0x8b   :  { %v244_v32 = vpack.c.bf16 %v458_v29, %v458_v29 }
  0x8d   :  { %v245_v34 = vadd.bf16 %v244_v32, %v237_v31 }
  0x8f   :  { %v253_v36 = vadd.bf16 %v252_v33, %v245_v34 }
  0x91   :  { %476 = vmatmul.mubr.msk.bf16.vlgmr.msra.gmra.mrb[0].mxu1 %vm263_vm8, %v253_v36 }
  0x92   :  { %480 = vmatpush3.bf16.msra.mxu1 %v320_v35  ;;  %481 = vmatprep.mubr.msk.bf16.mxu1 %vm567_vm4, %v564_v9 }
  0x93   :  { %485 = vmatprep.subr.bf16.mxu1 %v564_v9 }
  0x99   :  { %482 = vmatmul.mubr.msk.bf16.vlgmr.msra.gmra.mrb[4].mxu1 %vm263_vm8, %v253_v36 }
  0x9a   :  { %486 = vmatpush3.bf16.msra.mxu1 %v370_v38  ;;  %487 = vmatprep.mubr.msk.bf16.mxu1 %vm567_vm4, %v564_v9 }
  0xa1   :  { %488 = vmatmul.mubr.msk.bf16.vlgmr.msra.gmra.mrb[8].mxu1 %vm263_vm8, %v253_v36 }
  0xf6   :  { %v188_v47 = vpop.f32.mrb[0].mxu0 }
  0xf7   :  { %v209_v49 = vmul.f32 %v202_v44, %v188_v47  ;;  %v190_v50 = vpop.f32.mrb[1].mxu0 }
  0xf8   :  { %v210_v51 = vmul.f32 %v206_v45, %v190_v50  ;;  %v192_v52 = vpop.f32.mrb[2].mxu0 }
  0xf9   :  { %v193_v53 = vpop.f32.mrb[3].mxu0  ;;  %v223_v54 = vadd.f32 %v216_v46, %v209_v49 }
  0xfa   :  { %v224_v55 = vadd.f32 %v220_v48, %v210_v51 }
  0xfb   :  { %225 = vst [vmem:[#allocation2] sm:$0xff] %v223_v54 }
  0xfc   :  { %226 = vst [vmem:[#allocation2 + $0x8] sm:$0xff] %v224_v55 }
  0xfd   :  { %525 = shalt.err (!%p522_p4)
}
  0xfe   :  { %s526_s26 = scalar_lea.hbm %s704_s9, 256 }
  0xff   :  { %p527_p5 = scmp.ne.s32.totalorder %s704_s9, %s526_s26  ;;  %p530_p6 = scmp.lt.u32.totalorder %s526_s26, %s704_s9 }
 0x101   :  { %p532_p7 = pnand %p530_p6, %p527_p5 }
 0x103   :  { %535 = shalt.err (!%p532_p7)
}
 0x104   :  { %431 = dma.vmem_to_hbm [thread:$0]  %s429_s24, 256, %s704_s9, [#allocation3]   ;;  %v466_v2 = vld [vmem:[%s703_s8] ss:$0 sm:$0xff] }
 0x105   :  { %s569_s15 = smov [#allocation4]  }
 0x106   :  { %s438_s16 = sshll.u32 %s569_s15, 4  ;;  %s439_s16 = int_to_ptr.vmem [resolvable:$true] %s438_s16 }
 0x107   :  { %s536_s9 = scalar_lea.vmem %s439_s16, 128  ;;  %p541_p9 = scmp.lt.s32.totalorder %s439_s16, %s439_s16 }
 0x108   :  { %p537_p8 = scmp.ne.s32.totalorder %s439_s16, %s536_s9  ;;  %p542_p10 = scmp.lt.s32.totalorder %s536_s9, %s536_s9 }
 0x10a   :  { %p543_p11 = por %p542_p10, %p541_p9 }
 0x10c   :  { %p544_p12 = pnand %p543_p11, %p537_p8 }
 0x164   :  { %v308_v56 = vpop.f32.mrb[0].mxu1 }
 0x165   :  { %v477_v57 = vpop.f32.mrb[1].mxu1 }
 0x166   :  { %v311_v58 = vpop.f32.mrb[2].mxu1 }
 0x167   :  { %v478_v59 = vpop.f32.mrb[3].mxu1 }
 0x16c   :  { %v356_v60 = vpop.f32.mrb[4].mxu1 }
 0x16d   :  { %v357_v61 = vadd.f32 %v356_v60, %v308_v56  ;;  %v483_v62 = vpop.f32.mrb[5].mxu1 }
 0x16e   :  { %v359_v63 = vpop.f32.mrb[6].mxu1 }
 0x16f   :  { %v484_v0 = vpop.f32.mrb[7].mxu1 }
 0x174   :  { %v406_v1 = vpop.f32.mrb[8].mxu1 }
 0x175   :  { %v412_v3 = vadd.f32 %v406_v1, %v357_v61  ;;  %v489_v4 = vpop.f32.mrb[9].mxu1 }
 0x176   :  { %v409_v5 = vpop.f32.mrb[10].mxu1 }
 0x177   :  { %v490_v6 = vpop.f32.mrb[11].mxu1  ;;  %v420_v7 = vadd.f32 %v466_v2, %v412_v3 }
 0x179   :  { %421 = vst [vmem:[#allocation4] sm:$0xff] %v420_v7 }
 0x17a   :  { %547 = shalt.err (!%p544_p12)
}
 0x17b   :  { %s548_s8 = scalar_lea.hbm %s705_s10, 128 }
 0x17c   :  { %p549_p13 = scmp.ne.s32.totalorder %s705_s10, %s548_s8  ;;  %p552_p0 = scmp.lt.u32.totalorder %s548_s8, %s705_s10 }
 0x17e   :  { %p554_p1 = pnand %p552_p0, %p549_p13 }
 0x180   :  { %557 = shalt.err (!%p554_p1)
}
 0x181   :  { %441 = dma.vmem_to_hbm [thread:$0]  %s439_s16, 128, %s705_s10, [#allocation5]  }
 0x182   :  { %558 = dma.done.wait [#allocation3], 256  }
 0x183   :  { %559 = vsyncadd [#allocation3], 4294967040 }
 0x184   :  { %560 = dma.done.wait [#allocation5], 128  }
 0x185   :  { %561 = vsyncadd [#allocation5], 4294967168 }
 0x186   :  { %448 = vsyncpa [#allocation3], 1 }
 0x187   :  { %449 = vsyncpa [#allocation5], 1 }

// kernel: tpu_custom_call.1
= control target key start
LH: loop header
LB: loop body
LE: loop exit
PB: predicated region body
PF: predicated region fallthrough
CT: control target
= control target key end

     0   :  { %16 = vsyncpa [#allocation3], 0  ;;  %vm59_vm0 = vcmask 1041408   ;;  %v562_v2 = vmov 0   ;;  %v563_v3 = vmov 2   ;;  %v564_v9 = vmov 0.0   ;;  %s695_s0 = inlined_call_operand.vmem [shape: f32[8,4], index: 0, kind: input, shape index: {}]   ;;  %s696_s1 = inlined_call_operand.vmem [shape: s32[8,3], index: 1, kind: input, shape index: {}]   ;;  %s697_s2 = inlined_call_operand.vmem [shape: bf16[4,256], index: 2, kind: input, shape index: {}]   ;;  %s698_s3 = inlined_call_operand.vmem [shape: f32[1,256], index: 3, kind: input, shape index: {}]   ;;  %s699_s4 = inlined_call_operand.vmem [shape: f32[1,256], index: 4, kind: input, shape index: {}]   ;;  %s700_s5 = inlined_call_operand.vmem [shape: bf16[15,128], index: 5, kind: input, shape index: {}]   ;;  %s701_s6 = inlined_call_operand.vmem [shape: bf16[15,128], index: 6, kind: input, shape index: {}]   ;;  %s702_s7 = inlined_call_operand.vmem [shape: bf16[15,128], index: 7, kind: input, shape index: {}]   ;;  %s703_s8 = inlined_call_operand.vmem [shape: f32[1,128], index: 8, kind: input, shape index: {}]   ;;  %s704_s9 = inlined_call_operand.hbm [shape: f32[8,256], index: 9, kind: output, shape index: {0}]   ;;  %s705_s10 = inlined_call_operand.hbm [shape: f32[8,128], index: 10, kind: output, shape index: {1}]  }
   0x1   :  { %v227_v0 = vld [vmem:[%s696_s1] sm:$0xff]  ;;  %507 = vset.pattern.permute.xlu0 %v562_v2  ;;  %509 = vset.pattern.permute.xlu1 %v563_v3 }
   0x2   :  { %v37_v1 = vld [vmem:[%s695_s0] sm:$0xff]  ;;  %231 = vperm.xlu0 %507, %v227_v0   ;;  %247 = vperm.xlu1 %509, %v227_v0  }
   0x3   :  { %v450_v4 = vld.sshfl [vmem:[%s697_s2] sm:$0x33 pattern:$0x76325410]  ;;  %v38_v5 = vpack.c.bf16 %v37_v1, %v37_v1  ;;  %98 = vmatprep.mubr.bf16.mxu0 %v562_v2  ;;  %473 = vmatprep.subr.bf16.mxu1 %v564_v9 }
   0x4   :  { %v54_v6 = vcombine.high %v450_v4, %v450_v4  ;;  %v61_v7 = vsel %vm59_vm0, %v450_v4, 0 }
   0x5   :  { %v39_v8 = vunpack.c.l.bf16 %v38_v5 }
   0x6   :  { %451 = vmatprep.subr.msk.bf16.mxu0 %vm59_vm0, %v54_v6 }
   0x7   :  { %17 = vsyncpa [#allocation5], 0  ;;  %67 = vmatpush1.bf16.msra.mxu0 %v61_v7  ;;  %v40_v10 = vsub.f32 %v37_v1, %v39_v8  ;;  %v565_v11 = vmov 1   ;;  %vm55_vm1 = vcmask 31744   ;;  %vm267_vm2 = vcmask 1046528   ;;  %v511_v13 = vld [vmem:[%s701_s6] sm:$0xff]  }
   0x8   :  { %508 = vset.pattern.permute.xlu0 %v565_v11  ;;  %453 = vmatprep.subr.msk.bf16.mxu0 %vm59_vm0, %v54_v6  ;;  %vm268_vm3 = vcmask 1047552   ;;  %v566_v14 = vmov 65535   ;;  %vm567_vm4 = vmmov 0   ;;  %v199_v21 = vlaneseq  ;;  %v512_v30 = vld [vmem:[%s700_s5] sm:$0xff]   ;;  %s568_s23 = smov [#allocation2]  }
   0x9   :  { %239 = vperm.xlu0 %508, %v227_v0   ;;  %v41_v12 = vpack.c.bf16 %v40_v10, %v40_v10  ;;  %v269_v15 = vsel %vm267_vm2, 4294967295, %v566_v14  ;;  %475 = vmatprep.mubr.msk.bf16.mxu1 %vm567_vm4, %v564_v9  ;;  %vm263_vm8 = vcmask 121856   ;;  %v513_v37 = vld [vmem:[%s702_s7] sm:$0xff]   ;;  %s428_s24 = sshll.u32 %s568_s23, 4  ;;  %s429_s24 = int_to_ptr.vmem [resolvable:$true] %s428_s24 }
   0xa   :  { %v270_v16 = vsel %vm268_vm3, %v269_v15, 0  ;;  %v229_v22 = vand.u32 127, %v199_v21  ;;  %v200_v39 = vshrl.u32 %v199_v21, 7  ;;  %v197_v41 = vld [vmem:[%s698_s3] sm:$0x3]  ;;  %s514_s3 = scalar_lea.vmem %s429_s24, 256  ;;  %p519_p1 = scmp.lt.s32.totalorder %s429_s24, %s429_s24 }
   0xb   :  { %452 = vmatmul.mubr.msk.bf16.vlgmr.msra.gmra.mrb[0].mxu0 %vm55_vm1, %v41_v12  ;;  %v272_v17 = vand.u32 %v511_v13, %v270_v16  ;;  %v42_v18 = vunpack.c.l.bf16 %v41_v12  ;;  %v320_v35 = vand.u32 %v512_v30, %v270_v16  ;;  %v370_v38 = vand.u32 %v513_v37, %v270_v16  ;;  %v211_v43 = vld [vmem:[%s699_s4] sm:$0x3]  ;;  %p515_p0 = scmp.ne.s32.totalorder %s429_s24, %s514_s3  ;;  %p520_p2 = scmp.lt.s32.totalorder %s514_s3, %s514_s3 }
   0xc   :  { %111 = vmatpush1.bf16.msra.mxu0 %v61_v7  ;;  %142 = vmatprep.mubr.bf16.mxu0 %v562_v2  ;;  %v201_v40 = vsub.s32 0, %v200_v39  ;;  %v205_v42 = vsub.s32 1, %v200_v39 }
   0xd   :  { %455 = vmatprep.subr.msk.bf16.mxu0 %vm59_vm0, %v54_v6  ;;  %510 = vset.pattern.permute.xlu0 %v563_v3  ;;  %v43_v19 = vsub.f32 %v40_v10, %v42_v18  ;;  %p521_p3 = por %p520_p2, %p519_p1 }
   0xe   :  { %474 = vmatpush3.bf16.msra.mxu1 %v272_v17  ;;  %v202_v44 = vrot.slane %v197_v41, %v201_v40  ;;  %v206_v45 = vrot.slane %v197_v41, %v205_v42  ;;  %v216_v46 = vrot.slane %v211_v43, %v201_v40  ;;  %v220_v48 = vrot.slane %v211_v43, %v205_v42 }
   0xf   :  { %479 = vmatprep.subr.bf16.mxu1 %v564_v9  ;;  %v44_v20 = vpack.c.bf16 %v43_v19, %v43_v19  ;;  %p522_p4 = pnand %p521_p3, %p515_p0 }
  0x17   :  { %454 = vmatmul.mubr.msk.bf16.vlgmr.msra.gmra.mrb[0].mxu0 %vm55_vm1, %v38_v5 }
  0x18   :  { %155 = vmatpush1.bf16.msra.mxu0 %v61_v7  ;;  %186 = vmatprep.mubr.bf16.mxu0 %v562_v2 }
  0x23   :  { %456 = vmatmul.mubr.msk.bf16.vlgmr.msra.gmra.mrb[0].mxu0 %vm55_vm1, %v44_v20 }
  0x81   :  { %v232_v23 = vpop.permute.xlu0 %231  ;;  %v248_v24 = vpop.permute.xlu1 %247 }
  0x82   :  { %vm233_vm5 = vcmp.eq.s32.totalorder %v229_v22, %v232_v23  ;;  %vm249_vm6 = vcmp.eq.s32.totalorder %v229_v22, %v248_v24 }
  0x83   :  { %v457_v25 = vsel %vm233_vm5, 1.0, %v564_v9  ;;  %v459_v28 = vsel %vm249_vm6, 1.0, %v564_v9 }
  0x84   :  { %v236_v26 = vpack.c.bf16 %v457_v25, %v457_v25  ;;  %v252_v33 = vpack.c.bf16 %v459_v28, %v459_v28 }
  0x86   :  { %v237_v31 = vadd.bf16 0, %v236_v26 }
  0x88   :  { %v240_v27 = vpop.permute.xlu0 %239 }
  0x89   :  { %vm241_vm7 = vcmp.eq.s32.totalorder %v229_v22, %v240_v27 }
  0x8a   :  { %v458_v29 = vsel %vm241_vm7, 1.0, %v564_v9 }
  0x8b   :  { %v244_v32 = vpack.c.bf16 %v458_v29, %v458_v29 }
  0x8d   :  { %v245_v34 = vadd.bf16 %v244_v32, %v237_v31 }
  0x8f   :  { %v253_v36 = vadd.bf16 %v252_v33, %v245_v34 }
  0x91   :  { %476 = vmatmul.mubr.msk.bf16.vlgmr.msra.gmra.mrb[0].mxu1 %vm263_vm8, %v253_v36 }
  0x92   :  { %480 = vmatpush3.bf16.msra.mxu1 %v320_v35  ;;  %481 = vmatprep.mubr.msk.bf16.mxu1 %vm567_vm4, %v564_v9 }
  0x93   :  { %485 = vmatprep.subr.bf16.mxu1 %v564_v9 }
  0x99   :  { %482 = vmatmul.mubr.msk.bf16.vlgmr.msra.gmra.mrb[4].mxu1 %vm263_vm8, %v253_v36 }
  0x9a   :  { %486 = vmatpush3.bf16.msra.mxu1 %v370_v38  ;;  %487 = vmatprep.mubr.msk.bf16.mxu1 %vm567_vm4, %v564_v9 }
  0xa1   :  { %488 = vmatmul.mubr.msk.bf16.vlgmr.msra.gmra.mrb[8].mxu1 %vm263_vm8, %v253_v36 }
  0xf6   :  { %v188_v47 = vpop.f32.mrb[0].mxu0 }
  0xf7   :  { %v209_v49 = vmul.f32 %v202_v44, %v188_v47  ;;  %v190_v50 = vpop.f32.mrb[1].mxu0 }
  0xf8   :  { %v210_v51 = vmul.f32 %v206_v45, %v190_v50  ;;  %v192_v52 = vpop.f32.mrb[2].mxu0 }
  0xf9   :  { %v193_v53 = vpop.f32.mrb[3].mxu0  ;;  %v223_v54 = vadd.f32 %v216_v46, %v209_v49 }
  0xfa   :  { %v224_v55 = vadd.f32 %v220_v48, %v210_v51 }
  0xfb   :  { %225 = vst [vmem:[#allocation2] sm:$0xff] %v223_v54 }
  0xfc   :  { %226 = vst [vmem:[#allocation2 + $0x8] sm:$0xff] %v224_v55 }
  0xfd   :  { %525 = shalt.err (!%p522_p4)
}
  0xfe   :  { %s526_s26 = scalar_lea.hbm %s704_s9, 256 }
  0xff   :  { %p527_p5 = scmp.ne.s32.totalorder %s704_s9, %s526_s26  ;;  %p530_p6 = scmp.lt.u32.totalorder %s526_s26, %s704_s9 }
 0x101   :  { %p532_p7 = pnand %p530_p6, %p527_p5 }
 0x103   :  { %535 = shalt.err (!%p532_p7)
}
 0x104   :  { %431 = dma.vmem_to_hbm [thread:$0]  %s429_s24, 256, %s704_s9, [#allocation3]   ;;  %v466_v2 = vld [vmem:[%s703_s8] ss:$0 sm:$0xff] }
 0x105   :  { %s569_s15 = smov [#allocation4]  }
 0x106   :  { %s438_s16 = sshll.u32 %s569_s15, 4  ;;  %s439_s16 = int_to_ptr.vmem [resolvable:$true] %s438_s16 }
 0x107   :  { %s536_s9 = scalar_lea.vmem %s439_s16, 128  ;;  %p541_p9 = scmp.lt.s32.totalorder %s439_s16, %s439_s16 }
 0x108   :  { %p537_p8 = scmp.ne.s32.totalorder %s439_s16, %s536_s9  ;;  %p542_p10 = scmp.lt.s32.totalorder %s536_s9, %s536_s9 }
 0x10a   :  { %p543_p11 = por %p542_p10, %p541_p9 }
 0x10c   :  { %p544_p12 = pnand %p543_p11, %p537_p8 }
 0x164   :  { %v308_v56 = vpop.f32.mrb[0].mxu1 }
 0x165   :  { %v477_v57 = vpop.f32.mrb[1].mxu1 }
 0x166   :  { %v311_v58 = vpop.f32.mrb[2].mxu1 }
 0x167   :  { %v478_v59 = vpop.f32.mrb[3].mxu1 }
 0x16c   :  { %v356_v60 = vpop.f32.mrb[4].mxu1 }
 0x16d   :  { %v357_v61 = vadd.f32 %v356_v60, %v308_v56  ;;  %v483_v62 = vpop.f32.mrb[5].mxu1 }
 0x16e   :  { %v359_v63 = vpop.f32.mrb[6].mxu1 }
 0x16f   :  { %v484_v0 = vpop.f32.mrb[7].mxu1 }
 0x174   :  { %v406_v1 = vpop.f32.mrb[8].mxu1 }
 0x175   :  { %v412_v3 = vadd.f32 %v406_v1, %v357_v61  ;;  %v489_v4 = vpop.f32.mrb[9].mxu1 }
 0x176   :  { %v409_v5 = vpop.f32.mrb[10].mxu1 }
 0x177   :  { %v490_v6 = vpop.f32.mrb[11].mxu1  ;;  %v420_v7 = vadd.f32 %v466_v2, %v412_v3 }
 0x179   :  { %421 = vst [vmem:[#allocation4] sm:$0xff] %v420_v7 }
 0x17a   :  { %547 = shalt.err (!%p544_p12)
}
 0x17b   :  { %s548_s8 = scalar_lea.hbm %s705_s10, 128 }
 0x17c   :  { %p549_p13 = scmp.ne.s32.totalorder %s705_s10, %s548_s8  ;;  %p552_p0 = scmp.lt.u32.totalorder %s548_s8, %s705_s10 }
 0x17e   :  { %p554_p1 = pnand %p552_p0, %p549_p13 }
 0x180   :  { %557 = shalt.err (!%p554_p1)
}
 0x181   :  { %441 = dma.vmem_to_hbm [thread:$0]  %s439_s16, 128, %s705_s10, [#allocation5]  }
 0x182   :  { %558 = dma.done.wait [#allocation3], 256  }
 0x183   :  { %559 = vsyncadd [#allocation3], 4294967040 }
 0x184   :  { %560 = dma.done.wait [#allocation5], 128  }
 0x185   :  { %561 = vsyncadd [#allocation5], 4294967168 }
 0x186   :  { %448 = vsyncpa [#allocation3], 1 }
 0x187   :  { %449 = vsyncpa [#allocation5], 1 }

</bundles_post_ra>
